<compile_context>
chip_gen: v7x
topology: tpu7x:2x2x1
jax: 0.10.0
libtpu: 0.0.40
codegen_flags: <defaults>
</compile_context>

<pallas_src>
import jax
import jax.numpy as jnp
from jax.experimental import pallas as pl
from jax.experimental.pallas import tpu as pltpu

PAD = 128        # padded hidden width (>= 100), sublane/lane aligned
HIDDEN = 100     # true hidden width
TM_MAX = 2048    # max batch lanes per grid step (sweep 1024-4096 on v6e)


def pinn_kernel(x_ref, w2t_ref, w3t_ref, vec_ref, o_ref):
    # vec_ref is one (PAD, 8) f32 block of small operands (columns):
    #   col 0: w1 (Linear(1,100) weight) as a sublane column
    #   col 1: w4 (Linear(100,1) weight) as a sublane column
    #   col 2-4: b1, b2, b3
    #   [0, 5]: b4 (scalar bias of the last layer)
    v = vec_ref[...]
    w1_col = v[:, 0:1]                    # (PAD, 1)
    w4_col = v[:, 1:2]
    b1_col = v[:, 2:3]
    b2_col = v[:, 3:4]
    b3_col = v[:, 4:5]
    b4 = v[0:1, 5:6]                      # (1, 1) scalar

    x_row = x_ref[0]                      # (1, TM) f32, batch on lanes

    # Layer 1: Linear(1 -> 100) + ReLU as a VPU broadcast (no MXU), f32.
    h = jnp.maximum(w1_col * x_row + b1_col, 0.0)            # (PAD, TM) f32

    # Layers 2, 3: Linear(100 -> 100) + ReLU on the MXU.
    # Weights are pre-transposed (out, in), zero-padded to 128 and bf16;
    # accumulate in f32.  Zero padding keeps sublanes 100..127 exactly 0
    # through the ReLUs.
    h = jnp.dot(w2t_ref[...], h.astype(jnp.bfloat16),
                preferred_element_type=jnp.float32)          # (PAD, TM) f32
    h = jnp.maximum(h + b2_col, 0.0)
    h = jnp.dot(w3t_ref[...], h.astype(jnp.bfloat16),
                preferred_element_type=jnp.float32)
    h = jnp.maximum(h + b3_col, 0.0)

    # Layer 4: Linear(100 -> 1) as multiply + cross-sublane reduce; the
    # output is a lane-dense (1, TM) row -> unmasked stores.
    o_ref[0] = jnp.sum(h * w4_col, axis=0, keepdims=True) + b4


def _embed(arr, shape):
    out = jnp.zeros(shape, jnp.float32)
    return out.at[: arr.shape[0], : arr.shape[1]].set(arr.astype(jnp.float32))


def _round_up(x, m):
    return ((x + m - 1) // m) * m


@jax.jit
def pinn_forward(x, params):
    """x: (N, 1) float32 -> (N, 1) float32."""
    (w1, b1), (w2, b2), (w3, b3), (w4, b4) = params
    n = x.shape[0]

    # --- batch tiling: lane-dense, balanced, >=2 even steps for v7x megacore.
    n128 = _round_up(max(n, 1), 128)
    num_steps = pl.cdiv(n128, TM_MAX)
    if n128 > 256:
        num_steps = max(num_steps, 2)
        if num_steps % 2:
            num_steps += 1
    tm = _round_up(pl.cdiv(n128, num_steps), 128)
    n_pad = num_steps * tm

    # x laid out with the batch on the last (lane) axis.
    x_flat = jnp.pad(x.reshape(-1).astype(jnp.float32), (0, n_pad - n))
    x_p = x_flat.reshape(num_steps, 1, tm)

    # Pre-transposed, zero-padded, bf16 weights for the two 100x100 layers.
    w2t_p = _embed(w2.T, (PAD, PAD)).astype(jnp.bfloat16)
    w3t_p = _embed(w3.T, (PAD, PAD)).astype(jnp.bfloat16)

    # Fused small-operand block: w1 / w4 columns + biases (f32).
    vec = jnp.zeros((PAD, 8), jnp.float32)
    vec = vec.at[:HIDDEN, 0].set(w1.reshape(-1).astype(jnp.float32))
    vec = vec.at[:HIDDEN, 1].set(w4.reshape(-1).astype(jnp.float32))
    vec = vec.at[:HIDDEN, 2].set(b1.reshape(-1).astype(jnp.float32))
    vec = vec.at[:HIDDEN, 3].set(b2.reshape(-1).astype(jnp.float32))
    vec = vec.at[:HIDDEN, 4].set(b3.reshape(-1).astype(jnp.float32))
    vec = vec.at[0, 5].set(jnp.reshape(b4, ()).astype(jnp.float32))

    out = pl.pallas_call(
        pinn_kernel,
        out_shape=jax.ShapeDtypeStruct((num_steps, 1, tm), jnp.float32),
        grid_spec=pltpu.PrefetchScalarGridSpec(
            num_scalar_prefetch=0,
            grid=(num_steps,),
            in_specs=[
                pl.BlockSpec((1, 1, tm), lambda i: (i, 0, 0)),   # x (lanes)
                pl.BlockSpec((PAD, PAD), lambda i: (0, 0)),      # w2^T resident
                pl.BlockSpec((PAD, PAD), lambda i: (0, 0)),      # w3^T resident
                pl.BlockSpec((PAD, 8), lambda i: (0, 0)),        # fused small ops
            ],
            out_specs=pl.BlockSpec((1, 1, tm), lambda i: (i, 0, 0)),
        ),
        compiler_params=pltpu.CompilerParams(
            dimension_semantics=("parallel",)),
    )(x_p, w2t_p, w3t_p, vec)

    return out.reshape(n_pad, 1)[:n]


def init_params(key):
    """Deterministic init mirroring PyTorch nn.Linear default:
    U(-1/sqrt(fan_in), 1/sqrt(fan_in)) for both weight and bias."""
    dims = [(1, HIDDEN), (HIDDEN, HIDDEN), (HIDDEN, HIDDEN), (HIDDEN, 1)]
    params = []
    for (fan_in, fan_out) in dims:
        key, kw, kb = jax.random.split(key, 3)
        bound = 1.0 / jnp.sqrt(jnp.float32(fan_in))
        w = jax.random.uniform(kw, (fan_in, fan_out), jnp.float32,
                               minval=-bound, maxval=bound)
        b = jax.random.uniform(kb, (fan_out,), jnp.float32,
                               minval=-bound, maxval=bound)
        params.append((w, b))
    return params


def reference_forward(x, params):
    h = x.astype(jnp.float32)
    for i, (w, b) in enumerate(params):
        h = h @ w + b
        if i < len(params) - 1:
            h = jnp.maximum(h, 0.0)
    return h


if __name__ == "__main__":
    key = jax.random.PRNGKey(0)
    kp, kx1, kx2 = jax.random.split(key, 3)
    params = init_params(kp)

    # bf16 MXU operands (f32 accumulation) -> loosen the comparison tolerance
    # vs the pure-f32 reference.
    ATOL = 2e-2
    RTOL = 2e-2

    # Small batch of scalar inputs t in [0, 1); non-multiple-of-128 to
    # exercise the padding path (single-step grid).
    x_small = jax.random.uniform(kx1, (37, 1), jnp.float32)
    out_small = pinn_forward(x_small, params)
    jax.block_until_ready(out_small)
    ref_small = reference_forward(x_small, params)
    assert out_small.shape == (37, 1), out_small.shape
    assert jnp.allclose(out_small, ref_small, atol=ATOL, rtol=RTOL), (
        "small-batch mismatch vs pure-JAX reference")

    # Mid-size batch to exercise the multi-step (megacore-shardable) grid.
    x_mid = jax.random.uniform(kx2, (300, 1), jnp.float32)
    out_mid = pinn_forward(x_mid, params)
    jax.block_until_ready(out_mid)
    ref_mid = reference_forward(x_mid, params)
    assert out_mid.shape == (300, 1), out_mid.shape
    assert jnp.allclose(out_mid, ref_mid, atol=ATOL, rtol=RTOL), (
        "mid-batch mismatch vs pure-JAX reference")

    print("KERNEL_OK")
</pallas_src>

<mosaic_0001>
module attributes {stable_mosaic.version = 11 : i64} {
  func.func @pinn_kernel(%arg0: i32, %arg1: memref<1x1x128xf32, #tpu.memory_space<vmem>>, %arg2: memref<128x128xbf16, #tpu.memory_space<vmem>>, %arg3: memref<128x128xbf16, #tpu.memory_space<vmem>>, %arg4: memref<128x8xf32, #tpu.memory_space<vmem>>, %arg5: memref<1x1x128xf32, #tpu.memory_space<vmem>>) attributes {dimension_semantics = [#tpu.dimension_semantics<parallel>], iteration_bounds = array<i64: 1>, scalar_prefetch = 0 : i64, scratch_operands = 0 : i64, tpu.core_type = #tpu.core_type<tc>, window_params = [{transform_indices = @transform_0, window_bounds = array<i64: 1, 1, 128>}, {pipeline_mode = #tpu.pipeline_mode<synchronous>, transform_indices = @transform_1, window_bounds = array<i64: 128, 128>}, {pipeline_mode = #tpu.pipeline_mode<synchronous>, transform_indices = @transform_2, window_bounds = array<i64: 128, 128>}, {pipeline_mode = #tpu.pipeline_mode<synchronous>, transform_indices = @transform_3, window_bounds = array<i64: 128, 8>}, {transform_indices = @transform_4, window_bounds = array<i64: 1, 1, 128>}]} {
    %c0 = arith.constant 0 : index
    %c0_0 = arith.constant 0 : index
    %0 = vector.load %arg4[%c0, %c0_0] : memref<128x8xf32, #tpu.memory_space<vmem>>, vector<128x8xf32>
    %1 = vector.extract_strided_slice %0 {offsets = [0, 0], sizes = [128, 1], strides = [1, 1]} : vector<128x8xf32> to vector<128x1xf32>
    %2 = vector.extract_strided_slice %0 {offsets = [0, 1], sizes = [128, 1], strides = [1, 1]} : vector<128x8xf32> to vector<128x1xf32>
    %3 = vector.extract_strided_slice %0 {offsets = [0, 2], sizes = [128, 1], strides = [1, 1]} : vector<128x8xf32> to vector<128x1xf32>
    %4 = vector.extract_strided_slice %0 {offsets = [0, 3], sizes = [128, 1], strides = [1, 1]} : vector<128x8xf32> to vector<128x1xf32>
    %5 = vector.extract_strided_slice %0 {offsets = [0, 4], sizes = [128, 1], strides = [1, 1]} : vector<128x8xf32> to vector<128x1xf32>
    %6 = vector.extract_strided_slice %0 {offsets = [0, 5], sizes = [1, 1], strides = [1, 1]} : vector<128x8xf32> to vector<1x1xf32>
    %c0_1 = arith.constant 0 : index
    %c0_2 = arith.constant 0 : index
    %c0_3 = arith.constant 0 : index
    %7 = vector.load %arg1[%c0_1, %c0_2, %c0_3] : memref<1x1x128xf32, #tpu.memory_space<vmem>>, vector<1x1x128xf32>
    %8 = vector.shape_cast %7 : vector<1x1x128xf32> to vector<1x128xf32>
    %9 = vector.broadcast %1 : vector<128x1xf32> to vector<128x128xf32>
    %10 = vector.broadcast %8 : vector<1x128xf32> to vector<128x128xf32>
    %11 = arith.mulf %9, %10 : vector<128x128xf32>
    %12 = vector.broadcast %3 : vector<128x1xf32> to vector<128x128xf32>
    %13 = arith.addf %11, %12 : vector<128x128xf32>
    %cst = arith.constant 0.000000e+00 : f32
    %14 = vector.broadcast %cst : f32 to vector<128x128xf32>
    %15 = arith.maximumf %13, %14 : vector<128x128xf32>
    %c0_4 = arith.constant 0 : index
    %c0_5 = arith.constant 0 : index
    %16 = vector.load %arg2[%c0_4, %c0_5] : memref<128x128xbf16, #tpu.memory_space<vmem>>, vector<128x128xbf16>
    %17 = arith.truncf %15 : vector<128x128xf32> to vector<128x128xbf16>
    %cst_6 = arith.constant dense<0.000000e+00> : vector<128x128xf32>
    %18 = tpu.matmul %16, %17, %cst_6 {dimension_numbers = #tpu.dot_dimension_numbers<[1], [0], [0], [1], [0, 0, 1, 1], [], []>} : vector<128x128xbf16>, vector<128x128xbf16>, vector<128x128xf32> -> vector<128x128xf32>
    %19 = vector.broadcast %4 : vector<128x1xf32> to vector<128x128xf32>
    %20 = arith.addf %18, %19 : vector<128x128xf32>
    %cst_7 = arith.constant 0.000000e+00 : f32
    %21 = vector.broadcast %cst_7 : f32 to vector<128x128xf32>
    %22 = arith.maximumf %20, %21 : vector<128x128xf32>
    %c0_8 = arith.constant 0 : index
    %c0_9 = arith.constant 0 : index
    %23 = vector.load %arg3[%c0_8, %c0_9] : memref<128x128xbf16, #tpu.memory_space<vmem>>, vector<128x128xbf16>
    %24 = arith.truncf %22 : vector<128x128xf32> to vector<128x128xbf16>
    %cst_10 = arith.constant dense<0.000000e+00> : vector<128x128xf32>
    %25 = tpu.matmul %23, %24, %cst_10 {dimension_numbers = #tpu.dot_dimension_numbers<[1], [0], [0], [1], [0, 0, 1, 1], [], []>} : vector<128x128xbf16>, vector<128x128xbf16>, vector<128x128xf32> -> vector<128x128xf32>
    %26 = vector.broadcast %5 : vector<128x1xf32> to vector<128x128xf32>
    %27 = arith.addf %25, %26 : vector<128x128xf32>
    %cst_11 = arith.constant 0.000000e+00 : f32
    %28 = vector.broadcast %cst_11 : f32 to vector<128x128xf32>
    %29 = arith.maximumf %27, %28 : vector<128x128xf32>
    %30 = vector.broadcast %2 : vector<128x1xf32> to vector<128x128xf32>
    %31 = arith.mulf %29, %30 : vector<128x128xf32>
    %cst_12 = arith.constant dense<0.000000e+00> : vector<128xf32>
    %32 = vector.multi_reduction <add>, %31, %cst_12 [0] : vector<128x128xf32> to vector<128xf32>
    %33 = vector.shape_cast %32 : vector<128xf32> to vector<1x128xf32>
    %34 = vector.broadcast %6 : vector<1x1xf32> to vector<1x128xf32>
    %35 = arith.addf %33, %34 : vector<1x128xf32>
    %c0_13 = arith.constant 0 : index
    %c0_14 = arith.constant 0 : index
    %c0_15 = arith.constant 0 : index
    %36 = vector.load %arg5[%c0_13, %c0_14, %c0_15] : memref<1x1x128xf32, #tpu.memory_space<vmem>>, vector<1x1x128xf32>
    %37 = vector.shape_cast %36 : vector<1x1x128xf32> to vector<1x128xf32>
    %38 = vector.shape_cast %35 : vector<1x128xf32> to vector<1x1x128xf32>
    tpu.vector_store %arg5[%c0_13, %c0_14, %c0_15], %38 {strides = array<i32>} : memref<1x1x128xf32, #tpu.memory_space<vmem>>, vector<1x1x128xf32>,
    return
  }
  func.func @transform_0(%arg0: i32) -> (i32, i32, i32) {
    %c0_i32 = arith.constant 0 : i32
    %c0_i32_0 = arith.constant 0 : i32
    %c0_i32_1 = arith.constant 0 : i32
    return %arg0, %c0_i32, %c0_i32_0 : i32, i32, i32
  }
  func.func @transform_1(%arg0: i32) -> (i32, i32) {
    %c0_i32 = arith.constant 0 : i32
    %c0_i32_0 = arith.constant 0 : i32
    %c0_i32_1 = arith.constant 0 : i32
    return %c0_i32, %c0_i32_0 : i32, i32
  }
  func.func @transform_2(%arg0: i32) -> (i32, i32) {
    %c0_i32 = arith.constant 0 : i32
    %c0_i32_0 = arith.constant 0 : i32
    %c0_i32_1 = arith.constant 0 : i32
    return %c0_i32, %c0_i32_0 : i32, i32
  }
  func.func @transform_3(%arg0: i32) -> (i32, i32) {
    %c0_i32 = arith.constant 0 : i32
    %c0_i32_0 = arith.constant 0 : i32
    %c0_i32_1 = arith.constant 0 : i32
    return %c0_i32, %c0_i32_0 : i32, i32
  }
  func.func @transform_4(%arg0: i32) -> (i32, i32, i32) {
    %c0_i32 = arith.constant 0 : i32
    %c0_i32_0 = arith.constant 0 : i32
    %c0_i32_1 = arith.constant 0 : i32
    return %arg0, %c0_i32, %c0_i32_0 : i32, i32, i32
  }
}

</mosaic_0001>

<bundles_post_ra>
// kernel: pinn_forward.1
= control target key start
LH: loop header
LB: loop body
LE: loop exit
PB: predicated region body
PF: predicated region fallthrough
CT: control target
= control target key end

     0   :  { %v1011_v0 = vmov 2   ;;  %v1012_v7 = vmov 0   ;;  %v1013_v19 = vmov 3   ;;  %s1293_s3 = inlined_call_operand.vmem [shape: f32[128,8], index: 3, kind: input, shape index: {}]   ;;  %s1294_s1 = inlined_call_operand.vmem [shape: bf16[128,128], index: 1, kind: input, shape index: {}]   ;;  %s1295_s0 = inlined_call_operand.vmem [shape: f32[1,1,128], index: 0, kind: input, shape index: {}]   ;;  %s1296_s2 = inlined_call_operand.vmem [shape: bf16[128,128], index: 2, kind: input, shape index: {}]   ;;  %s1297_s4 = inlined_call_operand.vmem [shape: f32[1,1,128], index: 4, kind: output, shape index: {}]  }
   0x1   :  { %963 = vset.pattern.permute.xlu0 %v1011_v0  ;;  %961 = vset.pattern.permute.xlu1 %v1011_v0  ;;  %v1047_v1 = vld [vmem:[%s1293_s3 + $0x10] sm:$0xff]  ;;  %v1052_v2 = vld [vmem:[%s1293_s3] sm:$0xff]  ;;  %v1064_v4 = vld [vmem:[%s1293_s3 + $0x8] sm:$0xff] }
   0x2   :  { %146 = vperm.xlu0 %963, %v1047_v1   ;;  %138 = vperm.xlu1 %961, %v1052_v2   ;;  %v1059_v3 = vld [vmem:[%s1293_s3 + $0x30] sm:$0xff]  ;;  %v1076_v6 = vld [vmem:[%s1293_s3 + $0x18] sm:$0xff]  ;;  %v1086_v8 = vld [vmem:[%s1293_s3 + $0x20] sm:$0xff] }
   0x3   :  { %v1071_v5 = vld [vmem:[%s1293_s3 + $0x50] sm:$0xff]  ;;  %v1094_v9 = vld [vmem:[%s1293_s3 + $0x28] sm:$0xff]  ;;  %v1109_v11 = vld [vmem:[%s1293_s3 + $0x38] sm:$0xff] }
   0x4   :  { %v1104_v10 = vld [vmem:[%s1293_s3 + $0x48] sm:$0xff]  ;;  %v1124_v13 = vld [vmem:[%s1293_s3 + $0x40] sm:$0xff]  ;;  %v1130_v14 = vld [vmem:[%s1293_s3 + $0x70] sm:$0xff] }
   0x5   :  { %v1119_v12 = vld [vmem:[%s1293_s3 + $0x68] sm:$0xff]  ;;  %v1142_v15 = vld [vmem:[%s1293_s3 + $0x58] sm:$0xff]  ;;  %v1150_v16 = vld [vmem:[%s1293_s3 + $0x60] sm:$0xff] }
   0x6   :  { %162 = vperm.xlu0 %963, %v1059_v3   ;;  %142 = vperm.xlu1 %961, %v1064_v4   ;;  %v1159_v17 = vld [vmem:[%s1293_s3 + $0x78] sm:$0xff]  ;;  %v995_v18 = vld [vmem:[%s1294_s1] sm:$0xff]  }
   0x7   :  { %907 = vmatprep.mubr.bf16.mxu0 %v995_v18  ;;  %v1182_v26 = vld [vmem:[%s1295_s0] ss:$0 sm:$0xff] }
   0xa   :  { %178 = vperm.xlu0 %963, %v1071_v5   ;;  %962 = vset.pattern.permute.xlu1 %v1012_v7 }
   0xb   :  { %52 = vperm.xlu1 %962, %v1076_v6  }
   0xe   :  { %972 = vset.pattern.permute.xlu0 %v1012_v7 }
   0xf   :  { %37 = vperm.xlu0 %972, %v1052_v2   ;;  %964 = vset.pattern.permute.xlu1 %v1011_v0 }
  0x10   :  { %150 = vperm.xlu1 %964, %v1076_v6  }
  0x13   :  { %42 = vperm.xlu0 %972, %v1064_v4  }
  0x14   :  { %965 = vset.pattern.permute.xlu1 %v1012_v7 }
  0x15   :  { %57 = vperm.xlu1 %965, %v1086_v8  }
  0x17   :  { %47 = vperm.xlu0 %972, %v1047_v1  }
  0x19   :  { %966 = vset.pattern.permute.xlu1 %v1011_v0 }
  0x1a   :  { %154 = vperm.xlu1 %966, %v1086_v8  }
  0x1b   :  { %62 = vperm.xlu0 %972, %v1094_v9  }
  0x1e   :  { %158 = vperm.xlu1 %966, %v1094_v9  }
  0x1f   :  { %67 = vperm.xlu0 %972, %v1059_v3  }
  0x22   :  { %967 = vset.pattern.permute.xlu1 %v1012_v7 }
  0x23   :  { %82 = vperm.xlu0 %972, %v1104_v10   ;;  %72 = vperm.xlu1 %967, %v1109_v11  }
  0x27   :  { %87 = vperm.xlu0 %972, %v1071_v5   ;;  %968 = vset.pattern.permute.xlu1 %v1011_v0 }
  0x28   :  { %166 = vperm.xlu1 %968, %v1109_v11  }
  0x2b   :  { %102 = vperm.xlu0 %972, %v1119_v12  }
  0x2c   :  { %969 = vset.pattern.permute.xlu1 %v1012_v7 }
  0x2d   :  { %77 = vperm.xlu1 %969, %v1124_v13  }
  0x2f   :  { %107 = vperm.xlu0 %972, %v1130_v14  }
  0x31   :  { %970 = vset.pattern.permute.xlu1 %v1011_v0 }
  0x32   :  { %170 = vperm.xlu1 %970, %v1124_v13  }
  0x33   :  { %977 = vset.pattern.permute.xlu0 %v1011_v0 }
  0x34   :  { %194 = vperm.xlu0 %977, %v1130_v14  }
  0x36   :  { %174 = vperm.xlu1 %970, %v1104_v10  }
  0x38   :  { %980 = vset.pattern.permute.xlu0 %v1013_v19 }
  0x39   :  { %262 = vperm.xlu0 %980, %v1064_v4  }
  0x3a   :  { %971 = vset.pattern.permute.xlu1 %v1012_v7 }
  0x3b   :  { %92 = vperm.xlu1 %971, %v1142_v15  }
  0x3d   :  { %274 = vperm.xlu0 %980, %v1086_v8  }
  0x3f   :  { %973 = vset.pattern.permute.xlu1 %v1011_v0 }
  0x40   :  { %182 = vperm.xlu1 %973, %v1142_v15  }
  0x41   :  { %282 = vperm.xlu0 %980, %v1059_v3  }
  0x44   :  { %974 = vset.pattern.permute.xlu1 %v1012_v7 }
  0x45   :  { %97 = vperm.xlu1 %974, %v1150_v16   ;;  %290 = vperm.xlu0 %980, %v1124_v13  }
  0x49   :  { %975 = vset.pattern.permute.xlu1 %v1011_v0  ;;  %298 = vperm.xlu0 %980, %v1071_v5  }
  0x4a   :  { %186 = vperm.xlu1 %975, %v1150_v16  }
  0x4d   :  { %306 = vperm.xlu0 %980, %v1150_v16  }
  0x4e   :  { %190 = vperm.xlu1 %975, %v1119_v12  }
  0x51   :  { %314 = vperm.xlu0 %980, %v1130_v14  }
  0x52   :  { %976 = vset.pattern.permute.xlu1 %v1012_v7 }
  0x53   :  { %112 = vperm.xlu1 %976, %v1159_v17  }
  0x57   :  { %978 = vset.pattern.permute.xlu1 %v1011_v0 }
  0x58   :  { %198 = vperm.xlu1 %978, %v1159_v17  }
  0x5c   :  { %979 = vset.pattern.permute.xlu1 %v1013_v19 }
  0x5d   :  { %258 = vperm.xlu1 %979, %v1052_v2  }
  0x61   :  { %266 = vperm.xlu1 %979, %v1047_v1  }
  0x65   :  { %270 = vperm.xlu1 %979, %v1076_v6  }
  0x69   :  { %278 = vperm.xlu1 %979, %v1094_v9  }
  0x6d   :  { %286 = vperm.xlu1 %979, %v1109_v11  }
  0x71   :  { %294 = vperm.xlu1 %979, %v1104_v10  }
  0x75   :  { %302 = vperm.xlu1 %979, %v1142_v15  }
  0x79   :  { %310 = vperm.xlu1 %979, %v1119_v12  }
  0x7d   :  { %318 = vperm.xlu1 %979, %v1159_v17  }
  0x81   :  { %v139_v20 = vpop.permute.xlu1 %138  ;;  %v147_v21 = vpop.permute.xlu0 %146 }
  0x85   :  { %v143_v22 = vpop.permute.xlu1 %142  ;;  %v163_v23 = vpop.permute.xlu0 %162 }
  0x89   :  { %v1175_v24 = vpop.permute.xlu0 %178 }
  0x8a   :  { %v53_v25 = vpop.permute.xlu1 %52 }
  0x8b   :  { %v124_v34 = vmul.f32 %v1182_v26, %v53_v25 }
  0x8e   :  { %v38_v27 = vpop.permute.xlu0 %37 }
  0x8f   :  { %v121_v28 = vmul.f32 %v1182_v26, %v38_v27  ;;  %v151_v29 = vpop.permute.xlu1 %150 }
  0x90   :  { %v204_v38 = vadd.f32 %v151_v29, %v124_v34 }
  0x91   :  { %v201_v31 = vadd.f32 %v139_v20, %v121_v28 }
  0x92   :  { %v43_v30 = vpop.permute.xlu0 %42  ;;  %v220_v46 = vmax.f32 %v204_v38, 0.0 }
  0x93   :  { %v122_v32 = vmul.f32 %v1182_v26, %v43_v30  ;;  %v217_v37 = vmax.f32 %v201_v31, 0.0 }
  0x94   :  { %v58_v33 = vpop.permute.xlu1 %57 }
  0x95   :  { %v202_v35 = vadd.f32 %v143_v22, %v122_v32  ;;  %v125_v44 = vmul.f32 %v1182_v26, %v58_v33 }
  0x96   :  { %v48_v36 = vpop.permute.xlu0 %47 }
  0x97   :  { %v218_v39 = vmax.f32 %v202_v35, 0.0  ;;  %v123_v40 = vmul.f32 %v1182_v26, %v48_v36 }
  0x99   :  { %v203_v41 = vadd.f32 %v147_v21, %v123_v40  ;;  %v155_v42 = vpop.permute.xlu1 %154  ;;  %v249_v43 = vpack.c.bf16 %v218_v39, %v217_v37 }
  0x9a   :  { %v63_v45 = vpop.permute.xlu0 %62  ;;  %v205_v49 = vadd.f32 %v155_v42, %v125_v44 }
  0x9b   :  { %v219_v47 = vmax.f32 %v203_v41, 0.0  ;;  %v126_v48 = vmul.f32 %v1182_v26, %v63_v45  ;;  %891 = vmatprep.subr.bf16.mxu0 %v249_v43 }
  0x9c   :  { %892 = vmatpush3.bf16.msra.mxu0 %v249_v43  ;;  %v221_v53 = vmax.f32 %v205_v49, 0.0 }
  0x9d   :  { %v159_v50 = vpop.permute.xlu1 %158  ;;  %v250_v51 = vpack.c.bf16 %v220_v46, %v219_v47 }
  0x9e   :  { %v206_v52 = vadd.f32 %v159_v50, %v126_v48  ;;  %v68_v55 = vpop.permute.xlu0 %67 }
  0x9f   :  { %893 = vmatprep.subr.bf16.mxu0 %v250_v51  ;;  %v127_v57 = vmul.f32 %v1182_v26, %v68_v55 }
  0xa0   :  { %v222_v54 = vmax.f32 %v206_v52, 0.0  ;;  %894 = vmatpush3.bf16.msra.mxu0 %v250_v51 }
  0xa1   :  { %v207_v59 = vadd.f32 %v163_v23, %v127_v57 }
  0xa2   :  { %v251_v56 = vpack.c.bf16 %v222_v54, %v221_v53  ;;  %v73_v58 = vpop.permute.xlu1 %72  ;;  %v83_v19 = vpop.permute.xlu0 %82 }
  0xa3   :  { %v128_v60 = vmul.f32 %v1182_v26, %v73_v58  ;;  %v223_v63 = vmax.f32 %v207_v59, 0.0  ;;  %v130_v21 = vmul.f32 %v1182_v26, %v83_v19  ;;  %v1002_v19 = vld [vmem:[%s1294_s1 + $0x38] sm:$0xff]  }
  0xa4   :  { %895 = vmatprep.subr.bf16.mxu0 %v251_v56 }
  0xa5   :  { %896 = vmatpush3.bf16.msra.mxu0 %v251_v56 }
  0xa6   :  { %v88_v23 = vpop.permute.xlu0 %87 }
  0xa7   :  { %v167_v61 = vpop.permute.xlu1 %166  ;;  %v131_v31 = vmul.f32 %v1182_v26, %v88_v23 }
  0xa8   :  { %v208_v62 = vadd.f32 %v167_v61, %v128_v60 }
  0xa9   :  { %v211_v34 = vadd.f32 %v1175_v24, %v131_v31 }
  0xaa   :  { %v224_v0 = vmax.f32 %v208_v62, 0.0  ;;  %v103_v42 = vpop.permute.xlu0 %102  ;;  %v996_v62 = vld [vmem:[%s1294_s1 + $0x8] sm:$0xff]  }
  0xab   :  { %v227_v38 = vmax.f32 %v211_v34, 0.0  ;;  %v134_v45 = vmul.f32 %v1182_v26, %v103_v42 }
  0xac   :  { %v252_v7 = vpack.c.bf16 %v224_v0, %v223_v63  ;;  %v78_v18 = vpop.permute.xlu1 %77  ;;  %v997_v63 = vld [vmem:[%s1294_s1 + $0x10] sm:$0xff]   ;;  %v999_v0 = vld [vmem:[%s1294_s1 + $0x20] sm:$0xff]  }
  0xad   :  { %v129_v22 = vmul.f32 %v1182_v26, %v78_v18  ;;  %v1001_v18 = vld [vmem:[%s1294_s1 + $0x30] sm:$0xff]  }
  0xae   :  { %897 = vmatprep.subr.bf16.mxu0 %v252_v7  ;;  %v108_v47 = vpop.permute.xlu0 %107 }
  0xaf   :  { %898 = vmatpush3.bf16.msra.mxu0 %v252_v7  ;;  %v135_v51 = vmul.f32 %v1182_v26, %v108_v47  ;;  %v1000_v7 = vld [vmem:[%s1294_s1 + $0x28] sm:$0xff]  }
  0xb1   :  { %v171_v20 = vpop.permute.xlu1 %170 }
  0xb2   :  { %v209_v25 = vadd.f32 %v171_v20, %v129_v22  ;;  %v1003_v20 = vld [vmem:[%s1296_s2] sm:$0xff]   ;;  %v1015_v22 = vmov 1  }
  0xb3   :  { %v195_v54 = vpop.permute.xlu0 %194  ;;  %939 = vmatprep.mubr.bf16.mxu1 %v1003_v20 }
  0xb4   :  { %v225_v29 = vmax.f32 %v209_v25, 0.0  ;;  %v215_v55 = vadd.f32 %v195_v54, %v135_v51 }
  0xb5   :  { %v175_v27 = vpop.permute.xlu1 %174 }
  0xb6   :  { %v210_v28 = vadd.f32 %v175_v27, %v130_v21  ;;  %v231_v59 = vmax.f32 %v215_v55, 0.0  ;;  %v1014_v21 = vmov 4  }
  0xb7   :  { %982 = vset.pattern.permute.xlu1 %v1014_v21  ;;  %981 = vset.pattern.permute.xlu0 %v1014_v21 }
  0xb8   :  { %v226_v30 = vmax.f32 %v210_v28, 0.0  ;;  %511 = vperm.xlu1 %982, %v1064_v4   ;;  %507 = vperm.xlu0 %981, %v1052_v2  }
  0xba   :  { %v253_v32 = vpack.c.bf16 %v226_v30, %v225_v29  ;;  %v93_v33 = vpop.permute.xlu1 %92 }
  0xbb   :  { %v132_v35 = vmul.f32 %v1182_v26, %v93_v33 }
  0xbc   :  { %899 = vmatprep.subr.bf16.mxu0 %v253_v32  ;;  %515 = vperm.xlu1 %982, %v1047_v1  }
  0xbd   :  { %900 = vmatpush3.bf16.msra.mxu0 %v253_v32  ;;  %519 = vperm.xlu0 %981, %v1076_v6  }
  0xbf   :  { %v183_v36 = vpop.permute.xlu1 %182 }
  0xc0   :  { %v212_v37 = vadd.f32 %v183_v36, %v132_v35  ;;  %523 = vperm.xlu1 %982, %v1086_v8  }
  0xc1   :  { %527 = vperm.xlu0 %981, %v1094_v9  }
  0xc2   :  { %v228_v39 = vmax.f32 %v212_v37, 0.0 }
  0xc4   :  { %v254_v40 = vpack.c.bf16 %v228_v39, %v227_v38  ;;  %v98_v41 = vpop.permute.xlu1 %97  ;;  %983 = vset.pattern.permute.xlu1 %v1015_v22 }
  0xc5   :  { %v133_v44 = vmul.f32 %v1182_v26, %v98_v41  ;;  %531 = vperm.xlu0 %981, %v1059_v3   ;;  %732 = vperm.xlu1 %983, %v1052_v2  }
  0xc6   :  { %901 = vmatprep.subr.bf16.mxu0 %v254_v40 }
  0xc7   :  { %902 = vmatpush3.bf16.msra.mxu0 %v254_v40 }
  0xc9   :  { %v187_v43 = vpop.permute.xlu1 %186  ;;  %984 = vset.pattern.permute.xlu0 %v1015_v22  ;;  %740 = vperm.xlu1 %983, %v1047_v1  }
  0xca   :  { %v213_v46 = vadd.f32 %v187_v43, %v133_v44  ;;  %736 = vperm.xlu0 %984, %v1064_v4   ;;  %v1016_v4 = vmov 5  }
  0xcc   :  { %v229_v49 = vmax.f32 %v213_v46, 0.0 }
  0xcd   :  { %v191_v48 = vpop.permute.xlu1 %190  ;;  %744 = vperm.xlu1 %983, %v1076_v6  }
  0xce   :  { %v214_v24 = vadd.f32 %v191_v48, %v134_v45  ;;  %752 = vperm.xlu0 %984, %v1094_v9  }
  0xd0   :  { %v230_v50 = vmax.f32 %v214_v24, 0.0 }
  0xd1   :  { %748 = vperm.xlu1 %983, %v1086_v8   ;;  %v263_v8 = vpop.permute.xlu0 %262 }
  0xd2   :  { %v255_v52 = vpack.c.bf16 %v230_v50, %v229_v49  ;;  %v113_v53 = vpop.permute.xlu1 %112  ;;  %764 = vperm.xlu0 %984, %v1124_v13  }
  0xd3   :  { %v136_v56 = vmul.f32 %v1182_v26, %v113_v53  ;;  %v998_v26 = vld [vmem:[%s1294_s1 + $0x18] sm:$0xff]  }
  0xd4   :  { %903 = vmatprep.subr.bf16.mxu0 %v255_v52 }
  0xd5   :  { %904 = vmatpush3.bf16.msra.mxu0 %v255_v52  ;;  %985 = vset.pattern.permute.xlu1 %v1014_v21  ;;  %v275_v9 = vpop.permute.xlu0 %274 }
  0xd6   :  { %776 = vperm.xlu0 %984, %v1142_v15   ;;  %535 = vperm.xlu1 %985, %v1109_v11  }
  0xd7   :  { %v199_v57 = vpop.permute.xlu1 %198 }
  0xd8   :  { %v216_v58 = vadd.f32 %v199_v57, %v136_v56 }
  0xda   :  { %v232_v60 = vmax.f32 %v216_v58, 0.0  ;;  %990 = vset.pattern.permute.xlu0 %v1014_v21  ;;  %539 = vperm.xlu1 %985, %v1124_v13   ;;  %v283_v13 = vpop.permute.xlu0 %282 }
  0xdb   :  { %543 = vperm.xlu0 %990, %v1104_v10  }
  0xdc   :  { %v256_v61 = vpack.c.bf16 %v232_v60, %v231_v59  ;;  %v259_v1 = vpop.permute.xlu1 %258 }
  0xde   :  { %905 = vmatprep.subr.bf16.mxu0 %v256_v61  ;;  %986 = vset.pattern.permute.xlu1 %v1015_v22 }
  0xdf   :  { %906 = vmatpush3.bf16.msra.mxu0 %v256_v61  ;;  %555 = vperm.xlu0 %990, %v1150_v16  }
  0xe0   :  { %756 = vperm.xlu1 %986, %v1059_v3   ;;  %v267_v6 = vpop.permute.xlu1 %266 }
  0xe2   :  { %908 = vmatmul.mubr.bf16.vlgmr.msra.gmra.mrb[0].mxu0 %v996_v62 }
  0xe3   :  { %911 = vmatprep.mubr.bf16.mxu0 %v997_v63  ;;  %567 = vperm.xlu0 %990, %v1159_v17  }
  0xe4   :  { %760 = vperm.xlu1 %986, %v1109_v11   ;;  %v271_v3 = vpop.permute.xlu1 %270 }
  0xe7   :  { %992 = vset.pattern.permute.xlu0 %v1015_v22 }
  0xe8   :  { %987 = vset.pattern.permute.xlu1 %v1014_v21  ;;  %792 = vperm.xlu0 %992, %v1159_v17   ;;  %v279_v11 = vpop.permute.xlu1 %278 }
  0xe9   :  { %547 = vperm.xlu1 %987, %v1071_v5  }
  0xea   :  { %912 = vmatmul.mubr.bf16.gmra.mrb[4].mxu0 %v998_v26 }
  0xeb   :  { %915 = vmatprep.mubr.bf16.mxu0 %v999_v0 }
  0xec   :  { %994 = vset.pattern.permute.xlu0 %v1016_v4  ;;  %v287_v28 = vpop.permute.xlu1 %286 }
  0xed   :  { %551 = vperm.xlu1 %987, %v1142_v15  }
  0xf0   :  { %v295_v36 = vpop.permute.xlu1 %294 }
  0xf1   :  { %988 = vset.pattern.permute.xlu1 %v1015_v22 }
  0xf2   :  { %916 = vmatmul.mubr.bf16.gmra.mrb[8].mxu0 %v1000_v7  ;;  %768 = vperm.xlu1 %988, %v1104_v10  }
  0xf3   :  { %919 = vmatprep.mubr.bf16.mxu0 %v1001_v18 }
  0xf4   :  { %v303_v24 = vpop.permute.xlu1 %302 }
  0xf6   :  { %772 = vperm.xlu1 %988, %v1071_v5   ;;  %v291_v5 = vpop.permute.xlu0 %290 }
  0xf8   :  { %v311_v59 = vpop.permute.xlu1 %310 }
  0xfa   :  { %920 = vmatmul.mubr.bf16.gmra.mrb[12].mxu0 %v1002_v19  ;;  %989 = vset.pattern.permute.xlu1 %v1014_v21  ;;  %v299_v45 = vpop.permute.xlu0 %298 }
  0xfb   :  { %559 = vperm.xlu1 %989, %v1119_v12  }
  0xfc   :  { %v319_v21 = vpop.permute.xlu1 %318 }
  0xfe   :  { %v307_v55 = vpop.permute.xlu0 %306 }
  0xff   :  { %563 = vperm.xlu1 %989, %v1130_v14  }
 0x102   :  { %v315_v0 = vpop.permute.xlu0 %314 }
 0x103   :  { %991 = vset.pattern.permute.xlu1 %v1015_v22 }
 0x104   :  { %780 = vperm.xlu1 %991, %v1150_v16  }
 0x108   :  { %784 = vperm.xlu1 %991, %v1119_v12  }
 0x10c   :  { %788 = vperm.xlu1 %991, %v1130_v14  }
 0x110   :  { %993 = vset.pattern.permute.xlu1 %v1016_v4 }
 0x111   :  { %833 = vperm.xlu1 %993, %v1052_v2  }
 0x1b5   :  { %v909_v17 = vpop.f32.mrb[0].mxu0 }
 0x1b6   :  { %v412_v25 = vadd.f32 %v909_v17, %v267_v6  ;;  %v403_v27 = vpop.f32.mrb[1].mxu0 }
 0x1b7   :  { %v404_v23 = vadd.f32 %v403_v27, %v259_v1  ;;  %v910_v29 = vpop.f32.mrb[2].mxu0  ;;  %v1005_v27 = vld [vmem:[%s1296_s2 + $0x10] sm:$0xff]  }
 0x1b8   :  { %v415_v15 = vadd.f32 %v910_v29, %v271_v3  ;;  %v406_v30 = vpop.f32.mrb[3].mxu0  ;;  %v468_v31 = vmax.f32 %v412_v25, 0.0  ;;  %v1004_v25 = vld [vmem:[%s1296_s2 + $0x8] sm:$0xff]  }
 0x1b9   :  { %v407_v10 = vadd.f32 %v406_v30, %v263_v8  ;;  %v466_v33 = vmax.f32 %v404_v23, 0.0  ;;  %v1007_v23 = vld [vmem:[%s1296_s2 + $0x20] sm:$0xff]   ;;  %v1008_v29 = vld [vmem:[%s1296_s2 + $0x28] sm:$0xff]   ;;  %v1010_v30 = vld [vmem:[%s1296_s2 + $0x38] sm:$0xff]  }
 0x1ba   :  { %v469_v32 = vmax.f32 %v415_v15, 0.0  ;;  %v1009_v15 = vld [vmem:[%s1296_s2 + $0x30] sm:$0xff]  }
 0x1bb   :  { %v467_v34 = vmax.f32 %v407_v10, 0.0  ;;  %v512_v10 = vpop.permute.xlu1 %511 }
 0x1bc   :  { %v499_v35 = vpack.c.bf16 %v469_v32, %v468_v31 }
 0x1bd   :  { %v913_v37 = vpop.f32.mrb[4].mxu0  ;;  %v498_v38 = vpack.c.bf16 %v467_v34, %v466_v33 }
 0x1be   :  { %v428_v39 = vadd.f32 %v913_v37, %v283_v13  ;;  %v419_v40 = vpop.f32.mrb[5].mxu0 }
 0x1bf   :  { %v420_v41 = vadd.f32 %v419_v40, %v275_v9  ;;  %v914_v42 = vpop.f32.mrb[6].mxu0  ;;  %923 = vmatprep.subr.bf16.mxu1 %v498_v38  ;;  %v516_v31 = vpop.permute.xlu1 %515 }
 0x1c0   :  { %v431_v43 = vadd.f32 %v914_v42, %v287_v28  ;;  %v422_v44 = vpop.f32.mrb[7].mxu0  ;;  %924 = vmatpush3.bf16.msra.mxu1 %v498_v38  ;;  %v472_v47 = vmax.f32 %v428_v39, 0.0  ;;  %v1006_v28 = vld [vmem:[%s1296_s2 + $0x18] sm:$0xff]   ;;  %v508_v38 = vpop.permute.xlu0 %507 }
 0x1c1   :  { %v423_v46 = vadd.f32 %v422_v44, %v279_v11  ;;  %925 = vmatprep.subr.bf16.mxu1 %v499_v35  ;;  %v470_v16 = vmax.f32 %v420_v41, 0.0 }
 0x1c2   :  { %v473_v48 = vmax.f32 %v431_v43, 0.0 }
 0x1c3   :  { %v471_v49 = vmax.f32 %v423_v46, 0.0  ;;  %v524_v32 = vpop.permute.xlu1 %523 }
 0x1c4   :  { %v501_v50 = vpack.c.bf16 %v473_v48, %v472_v47  ;;  %926 = vmatpush3.bf16.msra.mxu1 %v499_v35  ;;  %v520_v40 = vpop.permute.xlu0 %519 }
 0x1c5   :  { %v500_v51 = vpack.c.bf16 %v471_v49, %v470_v16  ;;  %v917_v52 = vpop.f32.mrb[8].mxu0 }
 0x1c6   :  { %v444_v53 = vadd.f32 %v917_v52, %v299_v45  ;;  %v435_v54 = vpop.f32.mrb[9].mxu0 }
 0x1c7   :  { %v436_v56 = vadd.f32 %v435_v54, %v291_v5  ;;  %v918_v57 = vpop.f32.mrb[10].mxu0  ;;  %927 = vmatprep.subr.bf16.mxu1 %v500_v51  ;;  %v733_v5 = vpop.permute.xlu1 %732 }
 0x1c8   :  { %v447_v12 = vadd.f32 %v918_v57, %v303_v24  ;;  %v438_v58 = vpop.f32.mrb[11].mxu0  ;;  %928 = vmatpush3.bf16.msra.mxu1 %v500_v51  ;;  %v476_v61 = vmax.f32 %v444_v53, 0.0  ;;  %v528_v42 = vpop.permute.xlu0 %527 }
 0x1c9   :  { %v439_v60 = vadd.f32 %v438_v58, %v295_v36  ;;  %929 = vmatprep.subr.bf16.mxu1 %v501_v50  ;;  %v474_v62 = vmax.f32 %v436_v56, 0.0 }
 0x1ca   :  { %v477_v14 = vmax.f32 %v447_v12, 0.0 }
 0x1cb   :  { %v475_v63 = vmax.f32 %v439_v60, 0.0  ;;  %v741_v33 = vpop.permute.xlu1 %740 }
 0x1cc   :  { %v503_v26 = vpack.c.bf16 %v477_v14, %v476_v61  ;;  %930 = vmatpush3.bf16.msra.mxu1 %v501_v50  ;;  %v532_v44 = vpop.permute.xlu0 %531 }
 0x1cd   :  { %v502_v7 = vpack.c.bf16 %v475_v63, %v474_v62  ;;  %v921_v18 = vpop.f32.mrb[12].mxu0 }
 0x1ce   :  { %v460_v19 = vadd.f32 %v921_v18, %v315_v0  ;;  %v451_v20 = vpop.f32.mrb[13].mxu0 }
 0x1cf   :  { %v452_v22 = vadd.f32 %v451_v20, %v307_v55  ;;  %v922_v1 = vpop.f32.mrb[14].mxu0  ;;  %931 = vmatprep.subr.bf16.mxu1 %v502_v7  ;;  %v745_v34 = vpop.permute.xlu1 %744 }
 0x1d0   :  { %v463_v4 = vadd.f32 %v922_v1, %v319_v21  ;;  %v454_v6 = vpop.f32.mrb[15].mxu0  ;;  %932 = vmatpush3.bf16.msra.mxu1 %v502_v7  ;;  %v480_v2 = vmax.f32 %v460_v19, 0.0  ;;  %v737_v46 = vpop.permute.xlu0 %736 }
 0x1d1   :  { %v455_v8 = vadd.f32 %v454_v6, %v311_v59  ;;  %933 = vmatprep.subr.bf16.mxu1 %v503_v26  ;;  %v478_v9 = vmax.f32 %v452_v22, 0.0 }
 0x1d2   :  { %v481_v3 = vmax.f32 %v463_v4, 0.0 }
 0x1d3   :  { %v479_v11 = vmax.f32 %v455_v8, 0.0  ;;  %v749_v35 = vpop.permute.xlu1 %748 }
 0x1d4   :  { %v505_v13 = vpack.c.bf16 %v481_v3, %v480_v2  ;;  %934 = vmatpush3.bf16.msra.mxu1 %v503_v26  ;;  %v753_v48 = vpop.permute.xlu0 %752 }
 0x1d5   :  { %v504_v17 = vpack.c.bf16 %v479_v11, %v478_v9 }
 0x1d7   :  { %935 = vmatprep.subr.bf16.mxu1 %v504_v17  ;;  %v536_v36 = vpop.permute.xlu1 %535 }
 0x1d8   :  { %936 = vmatpush3.bf16.msra.mxu1 %v504_v17  ;;  %v765_v55 = vpop.permute.xlu0 %764 }
 0x1d9   :  { %937 = vmatprep.subr.bf16.mxu1 %v505_v13 }
 0x1db   :  { %v540_v37 = vpop.permute.xlu1 %539 }
 0x1dc   :  { %938 = vmatpush3.bf16.msra.mxu1 %v505_v13  ;;  %v777_v0 = vpop.permute.xlu0 %776 }
 0x1df   :  { %940 = vmatmul.mubr.bf16.vlgmr.msra.gmra.mrb[0].mxu1 %v1004_v25  ;;  %v757_v39 = vpop.permute.xlu1 %756 }
 0x1e0   :  { %943 = vmatprep.mubr.bf16.mxu1 %v1005_v27  ;;  %v544_v11 = vpop.permute.xlu0 %543 }
 0x1e3   :  { %v761_v41 = vpop.permute.xlu1 %760 }
 0x1e7   :  { %944 = vmatmul.mubr.bf16.gmra.mrb[4].mxu1 %v1006_v28  ;;  %v548_v43 = vpop.permute.xlu1 %547 }
 0x1e8   :  { %947 = vmatprep.mubr.bf16.mxu1 %v1007_v23 }
 0x1eb   :  { %v552_v45 = vpop.permute.xlu1 %551 }
 0x1ef   :  { %948 = vmatmul.mubr.bf16.gmra.mrb[8].mxu1 %v1008_v29  ;;  %v1287_v47 = vpop.permute.xlu1 %768 }
 0x1f0   :  { %951 = vmatprep.mubr.bf16.mxu1 %v1009_v15 }
 0x1f3   :  { %v773_v54 = vpop.permute.xlu1 %772 }
 0x1f7   :  { %952 = vmatmul.mubr.bf16.gmra.mrb[12].mxu1 %v1010_v30  ;;  %v560_v62 = vpop.permute.xlu1 %559 }
 0x1fb   :  { %v564_v17 = vpop.permute.xlu1 %563 }
 0x2b2   :  { %v941_v24 = vpop.f32.mrb[0].mxu1 }
 0x2b3   :  { %v652_v16 = vpop.f32.mrb[1].mxu1  ;;  %v661_v49 = vadd.f32 %v941_v24, %v516_v31 }
 0x2b4   :  { %v653_v50 = vadd.f32 %v652_v16, %v508_v38  ;;  %v942_v51 = vpop.f32.mrb[2].mxu1  ;;  %v556_v38 = vpop.permute.xlu0 %555 }
 0x2b5   :  { %v664_v52 = vadd.f32 %v942_v51, %v520_v40  ;;  %v655_v53 = vpop.f32.mrb[3].mxu1  ;;  %v717_v12 = vmax.f32 %v661_v49, 0.0 }
 0x2b6   :  { %v715_v56 = vmax.f32 %v653_v50, 0.0  ;;  %v656_v57 = vadd.f32 %v655_v53, %v512_v10 }
 0x2b7   :  { %v718_v59 = vmax.f32 %v664_v52, 0.0  ;;  %v797_v26 = vmul.f32 %v741_v33, %v717_v12 }
 0x2b8   :  { %v716_v58 = vmax.f32 %v656_v57, 0.0  ;;  %v795_v60 = vmul.f32 %v733_v5, %v715_v56  ;;  %v568_v51 = vpop.permute.xlu0 %567 }
 0x2b9   :  { %v798_v21 = vmul.f32 %v745_v34, %v718_v59 }
 0x2ba   :  { %v796_v61 = vmul.f32 %v737_v46, %v716_v58  ;;  %v945_v14 = vpop.f32.mrb[4].mxu1 }
 0x2bb   :  { %v668_v63 = vpop.f32.mrb[5].mxu1  ;;  %v677_v18 = vadd.f32 %v945_v14, %v532_v44 }
 0x2bc   :  { %v811_v7 = vadd.f32 %v796_v61, %v795_v60  ;;  %v669_v19 = vadd.f32 %v668_v63, %v524_v32  ;;  %v946_v20 = vpop.f32.mrb[6].mxu1 }
 0x2bd   :  { %v671_v22 = vpop.f32.mrb[7].mxu1  ;;  %v680_v6 = vadd.f32 %v946_v20, %v536_v36  ;;  %v721_v2 = vmax.f32 %v677_v18, 0.0 }
 0x2be   :  { %v812_v1 = vadd.f32 %v811_v7, %v797_v26  ;;  %v719_v4 = vmax.f32 %v669_v19, 0.0  ;;  %v672_v8 = vadd.f32 %v671_v22, %v528_v42  ;;  %v781_v42 = vpop.permute.xlu1 %780  ;;  %v793_v19 = vpop.permute.xlu0 %792 }
 0x2bf   :  { %v722_v27 = vmax.f32 %v680_v6, 0.0  ;;  %v801_v15 = vmul.f32 %v757_v39, %v721_v2 }
 0x2c0   :  { %v799_v3 = vmul.f32 %v749_v35, %v719_v4  ;;  %v813_v9 = vadd.f32 %v812_v1, %v798_v21  ;;  %v720_v13 = vmax.f32 %v672_v8, 0.0 }
 0x2c1   :  { %v802_v34 = vmul.f32 %v761_v41, %v722_v27 }
 0x2c2   :  { %v814_v25 = vadd.f32 %v813_v9, %v799_v3  ;;  %v800_v28 = vmul.f32 %v753_v48, %v720_v13  ;;  %v949_v23 = vpop.f32.mrb[8].mxu1  ;;  %v785_v57 = vpop.permute.xlu1 %784 }
 0x2c3   :  { %v684_v29 = vpop.f32.mrb[9].mxu1  ;;  %v693_v10 = vadd.f32 %v949_v23, %v548_v43 }
 0x2c4   :  { %v815_v30 = vadd.f32 %v814_v25, %v800_v28  ;;  %v685_v31 = vadd.f32 %v684_v29, %v540_v37  ;;  %v950_v32 = vpop.f32.mrb[10].mxu1 }
 0x2c5   :  { %v696_v5 = vadd.f32 %v950_v32, %v552_v45  ;;  %v687_v33 = vpop.f32.mrb[11].mxu1  ;;  %v725_v44 = vmax.f32 %v693_v10, 0.0 }
 0x2c6   :  { %v816_v36 = vadd.f32 %v815_v30, %v801_v15  ;;  %v723_v35 = vmax.f32 %v685_v31, 0.0  ;;  %v688_v40 = vadd.f32 %v687_v33, %v544_v11 }
 0x2c7   :  { %v726_v48 = vmax.f32 %v696_v5, 0.0  ;;  %v805_v37 = vmul.f32 %v773_v54, %v725_v44  ;;  %v789_v54 = vpop.permute.xlu1 %788 }
 0x2c8   :  { %v803_v46 = vmul.f32 %v765_v55, %v723_v35  ;;  %v817_v24 = vadd.f32 %v816_v36, %v802_v34  ;;  %v724_v16 = vmax.f32 %v688_v40, 0.0 }
 0x2c9   :  { %v806_v56 = vmul.f32 %v777_v0, %v726_v48 }
 0x2ca   :  { %v818_v49 = vadd.f32 %v817_v24, %v803_v46  ;;  %v804_v39 = vmul.f32 %v1287_v47, %v724_v16  ;;  %v953_v50 = vpop.f32.mrb[12].mxu1 }
 0x2cb   :  { %v700_v43 = vpop.f32.mrb[13].mxu1  ;;  %v709_v52 = vadd.f32 %v953_v50, %v564_v17 }
 0x2cc   :  { %v819_v45 = vadd.f32 %v818_v49, %v804_v39  ;;  %v701_v41 = vadd.f32 %v700_v43, %v556_v38  ;;  %v954_v53 = vpop.f32.mrb[14].mxu1 }
 0x2cd   :  { %v703_v12 = vpop.f32.mrb[15].mxu1  ;;  %v712_v55 = vadd.f32 %v954_v53, %v568_v51  ;;  %v729_v61 = vmax.f32 %v709_v52, 0.0 }
 0x2ce   :  { %v820_v58 = vadd.f32 %v819_v45, %v805_v37  ;;  %v727_v59 = vmax.f32 %v701_v41, 0.0  ;;  %v704_v60 = vadd.f32 %v703_v12, %v560_v62  ;;  %v834_v62 = vpop.permute.xlu1 %833 }
 0x2cf   :  { %v730_v7 = vmax.f32 %v712_v55, 0.0  ;;  %v809_v20 = vmul.f32 %v789_v54, %v729_v61 }
 0x2d0   :  { %v807_v14 = vmul.f32 %v781_v42, %v727_v59  ;;  %v821_v63 = vadd.f32 %v820_v58, %v806_v56  ;;  %v728_v26 = vmax.f32 %v704_v60, 0.0 }
 0x2d1   :  { %v810_v22 = vmul.f32 %v793_v19, %v730_v7 }
 0x2d2   :  { %v822_v47 = vadd.f32 %v821_v63, %v807_v14  ;;  %v808_v18 = vmul.f32 %v785_v57, %v728_v26 }
 0x2d4   :  { %v823_v21 = vadd.f32 %v822_v47, %v808_v18 }
 0x2d6   :  { %v824_v1 = vadd.f32 %v823_v21, %v809_v20 }
 0x2d8   :  { %v825_v0 = vadd.f32 %v824_v1, %v810_v22 }
 0x2da   :  { %v826_v4 = vrot.slane %v825_v0, 4 }
 0x2dc   :  { %v827_v6 = vadd.f32 %v826_v4, %v825_v0 }
 0x2de   :  { %v828_v8 = vrot.slane %v827_v6, 2 }
 0x2e0   :  { %v829_v2 = vadd.f32 %v828_v8, %v827_v6 }
 0x2e2   :  { %v830_v3 = vrot.slane %v829_v2, 1 }
 0x2e4   :  { %v831_v9 = vadd.f32 %v830_v3, %v829_v2 }
 0x2e6   :  { %v836_v11 = vadd.f32 %v834_v62, %v831_v9 }
 0x2e8   :  { %837 = vst [vmem:[%s1297_s4] sm:$0x1] %v836_v11 }

</bundles_post_ra>
